<compile_context>
chip_gen: v5e
topology: v5e:2x2
jax: 0.10.0
libtpu: 0.0.40
codegen_flags: <defaults>
</compile_context>

<pallas_src>
import functools

import jax
import jax.numpy as jnp
from jax.experimental import pallas as pl
from jax.experimental.pallas import tpu as pltpu

_LANES = 128


def _round_up(x, m):
    return ((x + m - 1) // m) * m


def _cdiv(a, b):
    return (a + b - 1) // b


def _rmse_kernel(yhat_ref, y_ref, out_ref, *, rows_bulk, tile_rows,
                 steps_per_stripe, full_tiles, needs_mask):
    """Grid = (stripe, step).  out_ref is the stripe's resident (8,128) partial sum."""
    s = pl.program_id(0)   # stripe (parallel; one per TensorCore on v7x)
    j = pl.program_id(1)   # step within stripe (arbitrary / reduction)

    @pl.when(j == 0)
    def _():
        out_ref[...] = jnp.zeros_like(out_ref)

    diff = yhat_ref[...].astype(jnp.float32) - y_ref[...].astype(jnp.float32)
    sq = diff * diff

    def accumulate(block):
        # Sublane/lane-preserving partial sums: (tile,128)->(k,8,128)->(8,128).
        out_ref[...] += block.reshape(tile_rows // 8, 8, _LANES).sum(axis=0)

    if needs_mask:
        g = s * steps_per_stripe + j          # unclamped global tile index
        # Tiles with index < full_tiles are entirely valid: no mask cost.
        @pl.when(g >= full_tiles)
        def _():
            row = g * tile_rows + jax.lax.broadcasted_iota(jnp.int32, sq.shape, 0)
            accumulate(jnp.where(row < rows_bulk, sq, 0.0))

        @pl.when(g < full_tiles)
        def _():
            accumulate(sq)
    else:
        accumulate(sq)


def rmse_loss(yhat, y, eps=1e-6, tile_rows=16384):
    assert yhat.shape == y.shape, (yhat.shape, y.shape)
    n_elems = yhat.size
    assert n_elems > 0

    yhat_f = yhat.reshape(-1)
    y_f = y.reshape(-1)

    rows_bulk = n_elems // _LANES
    n_bulk = rows_bulk * _LANES
    tail = n_elems - n_bulk

    # <128-element lane tail: summed with plain jnp (negligible), no full pad.
    if tail:
        d_t = (jax.lax.slice(yhat_f, (n_bulk,), (n_elems,)).astype(jnp.float32)
               - jax.lax.slice(y_f, (n_bulk,), (n_elems,)).astype(jnp.float32))
        tail_sq = jnp.sum(d_t * d_t)
    else:
        tail_sq = jnp.float32(0.0)

    if rows_bulk == 0:
        total = tail_sq
    else:
        if tail:
            # Only the ragged path slices the 128-divisible prefix; the common
            # case below is a free reshape of the original buffer.
            yh_b = jax.lax.slice(yhat_f, (0,), (n_bulk,))
            y_b = jax.lax.slice(y_f, (0,), (n_bulk,))
        else:
            yh_b, y_b = yhat_f, y_f
        yhat_2d = yh_b.reshape(rows_bulk, _LANES)
        y_2d = y_b.reshape(rows_bulk, _LANES)

        # Tile sizing: multiple of 32 rows, never larger than needed.
        tile_rows = max(32, min(int(tile_rows), _round_up(rows_bulk, 32)))
        tile_rows = _round_up(tile_rows, 32)

        total_tiles = _cdiv(rows_bulk, tile_rows)
        # 2 stripes feed v7x's two TensorCores.  Avoid it when an odd, small
        # tile count would make the duplicated (clamped+masked) tile a large
        # fraction of the HBM traffic.
        num_stripes = 2 if ((total_tiles >= 2 and total_tiles % 2 == 0)
                            or total_tiles >= 8) else 1
        steps_per_stripe = _cdiv(total_tiles, num_stripes)
        full_tiles = rows_bulk // tile_rows           # tiles that are entirely valid
        needs_mask = (rows_bulk % tile_rows != 0) or \
                     (num_stripes * steps_per_stripe > total_tiles)

        def in_index(s, j):
            g = s * steps_per_stripe + j
            # Clamp so padded stripe steps never request a fully out-of-range
            # block; their contribution is zeroed in-kernel by the row mask.
            return (jnp.minimum(g, total_tiles - 1), 0)

        kernel = functools.partial(
            _rmse_kernel,
            rows_bulk=rows_bulk,
            tile_rows=tile_rows,
            steps_per_stripe=steps_per_stripe,
            full_tiles=full_tiles,
            needs_mask=needs_mask,
        )

        partials = pl.pallas_call(
            kernel,
            out_shape=jax.ShapeDtypeStruct((num_stripes, 8, _LANES), jnp.float32),
            grid_spec=pltpu.PrefetchScalarGridSpec(
                num_scalar_prefetch=0,
                grid=(num_stripes, steps_per_stripe),
                in_specs=[
                    pl.BlockSpec((tile_rows, _LANES), in_index),
                    pl.BlockSpec((tile_rows, _LANES), in_index),
                ],
                # Per-stripe lane-dense (8,128) partial sum; resident across j.
                out_specs=pl.BlockSpec((None, 8, _LANES), lambda s, j: (s, 0, 0)),
            ),
            compiler_params=pltpu.CompilerParams(
                dimension_semantics=("parallel", "arbitrary"),
                vmem_limit_bytes=40 * 1024 * 1024,
            ),
        )(yhat_2d, y_2d)

        total = jnp.sum(partials) + tail_sq

    mse = total / jnp.float32(n_elems)
    return jnp.sqrt(mse + jnp.float32(eps))


if __name__ == "__main__":
    key = jax.random.PRNGKey(0)
    k1, k2, k3, k4, k5, k6 = jax.random.split(key, 6)

    # 1) NCHW prediction/target pair, lane-divisible (common fast path).
    yhat = jax.random.normal(k1, (2, 4, 16, 16), dtype=jnp.float32)
    y = jax.random.normal(k2, (2, 4, 16, 16), dtype=jnp.float32)
    loss = rmse_loss(yhat, y)
    jax.block_until_ready(loss)
    ref = jnp.sqrt(jnp.mean((yhat - y) ** 2) + 1e-6)
    assert jnp.allclose(loss, ref, atol=1e-5, rtol=1e-5), (loss, ref)

    # 2) Ragged element count: exercises the <128-element lane-tail path
    #    (summed in the wrapper, no full-array pad) + overhang-row masking.
    yhat2 = jax.random.normal(k3, (3, 5, 7, 11), dtype=jnp.float32)
    y2 = jax.random.normal(k4, (3, 5, 7, 11), dtype=jnp.float32)
    loss2 = rmse_loss(yhat2, y2)
    jax.block_until_ready(loss2)
    ref2 = jnp.sqrt(jnp.mean((yhat2 - y2) ** 2) + 1e-6)
    assert jnp.allclose(loss2, ref2, atol=1e-5, rtol=1e-5), (loss2, ref2)

    # 3) Odd tile count with a small tile override: exercises the two-stripe
    #    "parallel" grid axis, the clamped duplicate tile and its masking.
    yhat3 = jax.random.normal(k5, (2, 4, 36, 128), dtype=jnp.float32)
    y3 = jax.random.normal(k6, (2, 4, 36, 128), dtype=jnp.float32)
    loss3 = rmse_loss(yhat3, y3, tile_rows=32)
    jax.block_until_ready(loss3)
    ref3 = jnp.sqrt(jnp.mean((yhat3 - y3) ** 2) + 1e-6)
    assert jnp.allclose(loss3, ref3, atol=1e-5, rtol=1e-5), (loss3, ref3)

    print("KERNEL_OK")
</pallas_src>

<mosaic_0001>
module attributes {stable_mosaic.version = 11 : i64} {
  func.func @_rmse_kernel(%arg0: i32, %arg1: i32, %arg2: memref<32x128xf32, #tpu.memory_space<vmem>>, %arg3: memref<32x128xf32, #tpu.memory_space<vmem>>, %arg4: memref<1x8x128xf32, #tpu.memory_space<vmem>>) attributes {dimension_semantics = [#tpu.dimension_semantics<parallel>, #tpu.dimension_semantics<arbitrary>], iteration_bounds = array<i64: 1, 1>, scalar_prefetch = 0 : i64, scratch_operands = 0 : i64, tpu.core_type = #tpu.core_type<tc>, window_params = [{transform_indices = @transform_0, window_bounds = array<i64: 32, 128>}, {transform_indices = @transform_1, window_bounds = array<i64: 32, 128>}, {transform_indices = @transform_2, window_bounds = array<i64: 1, 8, 128>}]} {
    %c0_i32 = arith.constant 0 : i32
    %0 = arith.cmpi eq, %arg1, %c0_i32 : i32
    %1 = arith.extui %0 : i1 to i32
    %c0_i32_0 = arith.constant 0 : i32
    %2 = arith.cmpi ne, %1, %c0_i32_0 : i32
    scf.if %2 {
      %cst = arith.constant 0.000000e+00 : f32
      %15 = vector.broadcast %cst : f32 to vector<8x128xf32>
      %c0_8 = arith.constant 0 : index
      %c0_9 = arith.constant 0 : index
      %c0_10 = arith.constant 0 : index
      %16 = vector.load %arg4[%c0_8, %c0_9, %c0_10] : memref<1x8x128xf32, #tpu.memory_space<vmem>>, vector<1x8x128xf32>
      %17 = vector.shape_cast %16 : vector<1x8x128xf32> to vector<8x128xf32>
      %18 = vector.shape_cast %15 : vector<8x128xf32> to vector<1x8x128xf32>
      tpu.vector_store %arg4[%c0_8, %c0_9, %c0_10], %18 {strides = array<i32>} : memref<1x8x128xf32, #tpu.memory_space<vmem>>, vector<1x8x128xf32>,
    } else {
    }
    %c0 = arith.constant 0 : index
    %c0_1 = arith.constant 0 : index
    %3 = vector.load %arg2[%c0, %c0_1] : memref<32x128xf32, #tpu.memory_space<vmem>>, vector<32x128xf32>
    %c0_2 = arith.constant 0 : index
    %c0_3 = arith.constant 0 : index
    %4 = vector.load %arg3[%c0_2, %c0_3] : memref<32x128xf32, #tpu.memory_space<vmem>>, vector<32x128xf32>
    %5 = arith.subf %3, %4 : vector<32x128xf32>
    %6 = arith.mulf %5, %5 : vector<32x128xf32>
    %c1_i32 = arith.constant 1 : i32
    %7 = arith.muli %arg0, %c1_i32 : i32
    %8 = arith.addi %7, %arg1 : i32
    %c0_i32_4 = arith.constant 0 : i32
    %9 = arith.cmpi sge, %8, %c0_i32_4 : i32
    %10 = arith.extui %9 : i1 to i32
    %c0_i32_5 = arith.constant 0 : i32
    %11 = arith.cmpi ne, %10, %c0_i32_5 : i32
    scf.if %11 {
      %c32_i32 = arith.constant 32 : i32
      %15 = arith.muli %8, %c32_i32 : i32
      %16 = tpu.iota {dimensions = array<i32: 0>} : vector<32x128xi32>
      %17 = vector.broadcast %15 : i32 to vector<32x128xi32>
      %18 = arith.addi %17, %16 : vector<32x128xi32>
      %c16_i32 = arith.constant 16 : i32
      %19 = vector.broadcast %c16_i32 : i32 to vector<32x128xi32>
      %20 = arith.cmpi slt, %18, %19 : vector<32x128xi32>
      %cst = arith.constant 0.000000e+00 : f32
      %21 = vector.broadcast %cst : f32 to vector<32x128xf32>
      %22 = arith.select %20, %6, %21 : vector<32x128xi1>, vector<32x128xf32>
      %c0_8 = arith.constant 0 : index
      %c0_9 = arith.constant 0 : index
      %c0_10 = arith.constant 0 : index
      %23 = vector.load %arg4[%c0_8, %c0_9, %c0_10] : memref<1x8x128xf32, #tpu.memory_space<vmem>>, vector<1x8x128xf32>
      %24 = vector.shape_cast %23 : vector<1x8x128xf32> to vector<8x128xf32>
      %25 = vector.shape_cast %22 : vector<32x128xf32> to vector<4x8x128xf32>
      %cst_11 = arith.constant dense<0.000000e+00> : vector<8x128xf32>
      %26 = vector.multi_reduction <add>, %25, %cst_11 [0] : vector<4x8x128xf32> to vector<8x128xf32>
      %27 = arith.addf %24, %26 : vector<8x128xf32>
      %c0_12 = arith.constant 0 : index
      %c0_13 = arith.constant 0 : index
      %c0_14 = arith.constant 0 : index
      %28 = vector.load %arg4[%c0_12, %c0_13, %c0_14] : memref<1x8x128xf32, #tpu.memory_space<vmem>>, vector<1x8x128xf32>
      %29 = vector.shape_cast %28 : vector<1x8x128xf32> to vector<8x128xf32>
      %30 = vector.shape_cast %27 : vector<8x128xf32> to vector<1x8x128xf32>
      tpu.vector_store %arg4[%c0_12, %c0_13, %c0_14], %30 {strides = array<i32>} : memref<1x8x128xf32, #tpu.memory_space<vmem>>, vector<1x8x128xf32>,
    } else {
    }
    %c0_i32_6 = arith.constant 0 : i32
    %12 = arith.cmpi slt, %8, %c0_i32_6 : i32
    %13 = arith.extui %12 : i1 to i32
    %c0_i32_7 = arith.constant 0 : i32
    %14 = arith.cmpi ne, %13, %c0_i32_7 : i32
    scf.if %14 {
      %c0_8 = arith.constant 0 : index
      %c0_9 = arith.constant 0 : index
      %c0_10 = arith.constant 0 : index
      %15 = vector.load %arg4[%c0_8, %c0_9, %c0_10] : memref<1x8x128xf32, #tpu.memory_space<vmem>>, vector<1x8x128xf32>
      %16 = vector.shape_cast %15 : vector<1x8x128xf32> to vector<8x128xf32>
      %17 = vector.shape_cast %6 : vector<32x128xf32> to vector<4x8x128xf32>
      %cst = arith.constant dense<0.000000e+00> : vector<8x128xf32>
      %18 = vector.multi_reduction <add>, %17, %cst [0] : vector<4x8x128xf32> to vector<8x128xf32>
      %19 = arith.addf %16, %18 : vector<8x128xf32>
      %c0_11 = arith.constant 0 : index
      %c0_12 = arith.constant 0 : index
      %c0_13 = arith.constant 0 : index
      %20 = vector.load %arg4[%c0_11, %c0_12, %c0_13] : memref<1x8x128xf32, #tpu.memory_space<vmem>>, vector<1x8x128xf32>
      %21 = vector.shape_cast %20 : vector<1x8x128xf32> to vector<8x128xf32>
      %22 = vector.shape_cast %19 : vector<8x128xf32> to vector<1x8x128xf32>
      tpu.vector_store %arg4[%c0_11, %c0_12, %c0_13], %22 {strides = array<i32>} : memref<1x8x128xf32, #tpu.memory_space<vmem>>, vector<1x8x128xf32>,
    } else {
    }
    return
  }
  func.func @transform_0(%arg0: i32, %arg1: i32) -> (i32, i32) {
    %c1_i32 = arith.constant 1 : i32
    %0 = arith.muli %arg0, %c1_i32 : i32
    %1 = arith.addi %0, %arg1 : i32
    %c0_i32 = arith.constant 0 : i32
    %2 = arith.minsi %1, %c0_i32 : i32
    %c0_i32_0 = arith.constant 0 : i32
    %c0_i32_1 = arith.constant 0 : i32
    return %2, %c0_i32_0 : i32, i32
  }
  func.func @transform_1(%arg0: i32, %arg1: i32) -> (i32, i32) {
    %c1_i32 = arith.constant 1 : i32
    %0 = arith.muli %arg0, %c1_i32 : i32
    %1 = arith.addi %0, %arg1 : i32
    %c0_i32 = arith.constant 0 : i32
    %2 = arith.minsi %1, %c0_i32 : i32
    %c0_i32_0 = arith.constant 0 : i32
    %c0_i32_1 = arith.constant 0 : i32
    return %2, %c0_i32_0 : i32, i32
  }
  func.func @transform_2(%arg0: i32, %arg1: i32) -> (i32, i32, i32) {
    %c0_i32 = arith.constant 0 : i32
    %c0_i32_0 = arith.constant 0 : i32
    %c0_i32_1 = arith.constant 0 : i32
    return %arg0, %c0_i32, %c0_i32_0 : i32, i32, i32
  }
}

</mosaic_0001>

<bundles_post_ra>
// kernel: tpu_custom_call.1
= control target key start
LH: loop header
LB: loop body
LE: loop exit
PB: predicated region body
PF: predicated region fallthrough
CT: control target
= control target key end

     0   :  { %7 = vsyncpa [#allocation3], 0  ;;  %s274_s0 = inlined_call_operand.hbm [shape: f32[16,128], index: 0, kind: input, shape index: {}]   ;;  %s275_s1 = inlined_call_operand.hbm [shape: f32[16,128], index: 1, kind: input, shape index: {}]   ;;  %s276_s2 = inlined_call_operand.hbm [shape: f32[1,8,128], index: 2, kind: output, shape index: {}]  }
   0x1   :  { %8 = vsyncpa [#allocation6], 0 }
   0x2   :  { %9 = vsyncpa [#allocation4], 0 }
   0x3   :  { %20 = vsyncadd [#allocation3], 256  ;;  %s25_s11 = sshll.u32 %s274_s0, 4  ;;  %s245_s12 = smov [#allocation2]   ;;  %s26_s11 = int_to_ptr.hbm [resolvable:$true] %s25_s11 }
   0x4   :  { %s27_s13 = sshll.u32 %s245_s12, 4  ;;  %s246_s14 = smov 128   ;;  %s28_s13 = int_to_ptr.vmem [resolvable:$true] %s27_s13 }
   0x5   :  { %s247_s15 = smov 8  }
   0x6   :  { %33 = dma.hbm_to_vmem [thread:$0]  %s26_s11, 256, %s28_s13, [#allocation3], %s246_s14, %s246_s14, %s247_s15  }
   0x7   :  { %44 = vsyncadd [#allocation6], 256  ;;  %s49_s18 = sshll.u32 %s275_s1, 4  ;;  %s248_s19 = smov [#allocation5]   ;;  %s50_s18 = int_to_ptr.hbm [resolvable:$true] %s49_s18 }
   0x8   :  { %s51_s20 = sshll.u32 %s248_s19, 4  ;;  %s52_s20 = int_to_ptr.vmem [resolvable:$true] %s51_s20 }
   0x9   :  { %57 = dma.hbm_to_vmem [thread:$0]  %s50_s18, 256, %s52_s20, [#allocation6], %s246_s14, %s246_s14, %s247_s15  }
   0xa   :  { %239 = dma.done.wait [#allocation3], 512  }
   0xb   :  { %240 = vsyncadd [#allocation3], 4294966784 }
   0xc   :  { %241 = dma.done.wait [#allocation6], 512  }
   0xd   :  { %242 = vsyncadd [#allocation6], 4294966784  ;;  %v83_v0 = vld [vmem:[#allocation2] sm:$0xff]  ;;  %v84_v1 = vld [vmem:[#allocation2 + $0x8] sm:$0xff]  ;;  %s249_s0 = smov [#allocation7]   ;;  %s146_s23 = sshll.u32 %s276_s2, 4  ;;  %s147_s23 = int_to_ptr.hbm [resolvable:$true] %s146_s23 }
   0xe   :  { %v87_v2 = vld [vmem:[#allocation5] sm:$0xff]  ;;  %v88_v3 = vld [vmem:[#allocation5 + $0x8] sm:$0xff]  ;;  %s144_s21 = sshll.u32 %s249_s0, 4  ;;  %s145_s21 = int_to_ptr.vmem [resolvable:$true] %s144_s21 }
   0xf   :  { %v91_v4 = vsub.f32 %v83_v0, %v87_v2  ;;  %v92_v5 = vsub.f32 %v84_v1, %v88_v3 }
  0x11   :  { %v95_v6 = vmul.f32 %v91_v4, %v91_v4  ;;  %v96_v7 = vmul.f32 %v92_v5, %v92_v5 }
  0x13   :  { %v124_v8 = vadd.f32 %v96_v7, %v95_v6 }
  0x15   :  { %128 = vst [vmem:[#allocation7] sm:$0xff] %v124_v8 }
  0x16   :  { %149 = dma.vmem_to_hbm [thread:$0]  %s145_s21, 128, %s147_s23, [#allocation4]  }
  0x17   :  { %243 = dma.done.wait [#allocation4], 128  }
  0x18   :  { %244 = vsyncadd [#allocation4], 4294967168 }
  0x19   :  { %154 = vsyncpa [#allocation3], 1 }
  0x1a   :  { %155 = vsyncpa [#allocation6], 1 }
  0x1b   :  { %156 = vsyncpa [#allocation4], 1 }

</bundles_post_ra>
